<compile_context>
chip_gen: v5e
topology: v5e:2x2
jax: 0.10.0
libtpu: 0.0.40
codegen_flags: <defaults>
</compile_context>

<pallas_src>
import jax
import jax.numpy as jnp
from jax.experimental import pallas as pl
from jax.experimental.pallas import tpu as pltpu

LANES = 512                      # lane width of the 2D slab (multiple of 128)
MAX_BLOCK_ROWS = 1024            # 1024 x 512 f32 = 2 MiB per input per buffer
SMALL_INPUT_THRESHOLD = 128 * 1024  # below this, a fused XLA reduction is faster


def _make_sums_kernel(block_rows, total_rows, need_row_mask):
    """Builds the reduction kernel for a fixed (static) block geometry."""

    def kernel(p_ref, t_ref, out_ref):
        step = pl.program_id(0)

        @pl.when(step == 0)
        def _():
            out_ref[...] = jnp.zeros_like(out_ref)

        p = p_ref[...].astype(jnp.float32)
        t = t_ref[...].astype(jnp.float32)

        if need_row_mask:
            # The last block overhangs the array; zero the invalid rows BEFORE any
            # arithmetic so stale VMEM contents never reach the sums.  (p=0, t=0)
            # contributes exactly 0 to p*t, p, t and the clamped bce term.
            row = jax.lax.broadcasted_iota(jnp.int32, p.shape, 0)
            valid = (step * block_rows + row) < total_rows
            p = jnp.where(valid, p, 0.0)
            t = jnp.where(valid, t, 0.0)

        # PyTorch-style BCE: logs clamped at -100 BEFORE the multiply, so p==0 / p==1
        # (and masked / zero-padded elements) never produce NaN or Inf.
        log_p = jnp.maximum(jnp.log(p), -100.0)
        log_1mp = jnp.maximum(jnp.log(1.0 - p), -100.0)
        bce = -(t * (log_p - log_1mp) + log_1mp)

        # Per-lane partial sums accumulated into fixed rows of the VMEM-resident
        # output block; it is written back to HBM only once, after the last step.
        out_ref[0:1, :] += jnp.sum(p * t, axis=0, keepdims=True)
        out_ref[1:2, :] += jnp.sum(p, axis=0, keepdims=True)
        out_ref[2:3, :] += jnp.sum(t, axis=0, keepdims=True)
        out_ref[3:4, :] += jnp.sum(bce, axis=0, keepdims=True)

    return kernel


def _ds_loss_pallas(prediction, target, smooth=1.0):
    """DS_Loss via a streaming Pallas reduction over a lane-dense (rows, 512) slab."""
    n_valid = prediction.size

    flat_p = prediction.reshape(-1)
    flat_t = target.reshape(-1)

    # Only the sub-LANES tail (< 512 elements) is ever padded.  Zero padding
    # contributes exactly 0 to every partial sum, so no correction is needed.
    rem = n_valid % LANES
    if rem:
        pad = LANES - rem
        flat_p = jnp.pad(flat_p, (0, pad))
        flat_t = jnp.pad(flat_t, (0, pad))

    rows = flat_p.size // LANES
    if rows <= MAX_BLOCK_ROWS:
        block_rows = rows                    # single full-extent block (always legal)
    else:
        block_rows = MAX_BLOCK_ROWS          # multiple of 32 (packed-dtype safe)

    grid_steps = pl.cdiv(rows, block_rows)
    need_row_mask = (rows % block_rows) != 0  # last block overhangs -> mask in-kernel

    p2 = flat_p.reshape(rows, LANES)
    t2 = flat_t.reshape(rows, LANES)

    in_spec = pl.BlockSpec((block_rows, LANES), lambda i: (i, 0))
    out_spec = pl.BlockSpec((4, LANES), lambda i: (0, 0))  # resident across the grid

    sums = pl.pallas_call(
        _make_sums_kernel(block_rows, rows, need_row_mask),
        out_shape=jax.ShapeDtypeStruct((4, LANES), jnp.float32),
        grid_spec=pltpu.PrefetchScalarGridSpec(
            num_scalar_prefetch=0,
            grid=(grid_steps,),
            in_specs=[in_spec, in_spec],
            out_specs=out_spec,
        ),
        compiler_params=pltpu.CompilerParams(
            dimension_semantics=("arbitrary",),   # reduction axis
            vmem_limit_bytes=32 * 1024 * 1024,
        ),
    )(p2, t2)

    s = jnp.sum(sums, axis=1)  # reduce lane axis -> (4,)
    s_pt, s_p, s_t, s_bce = s[0], s[1], s[2], s[3]

    # DiceLoss(log_cosh=True)
    dice = (2.0 * s_pt + smooth) / (s_p + s_t + smooth)
    log_cosh_dice = jnp.log(jnp.cosh(1.0 - dice))
    # BCELoss(weights=None) -> plain mean over the valid elements
    bce_mean = s_bce / n_valid
    return log_cosh_dice + bce_mean


def ds_loss(prediction, target, smooth=1.0):
    """Public entry point: small inputs use a fused pure-JAX path (launch overhead
    dominates there); larger inputs use the Pallas streaming reduction."""
    if prediction.size < SMALL_INPUT_THRESHOLD:
        return ds_loss_ref(prediction, target, smooth)
    return _ds_loss_pallas(prediction, target, smooth)


def ds_loss_ref(prediction, target, smooth=1.0):
    """Pure-JAX reference replicating the PyTorch semantics."""
    p = prediction.astype(jnp.float32).reshape(-1)
    t = target.astype(jnp.float32).reshape(-1)
    inter = jnp.sum(p * t)
    dice = (2.0 * inter + smooth) / (jnp.sum(p) + jnp.sum(t) + smooth)
    dl = jnp.log(jnp.cosh(1.0 - dice))
    bce = jnp.mean(-(t * jnp.maximum(jnp.log(p), -100.0)
                     + (1.0 - t) * jnp.maximum(jnp.log(1.0 - p), -100.0)))
    return dl + bce


if __name__ == "__main__":
    key = jax.random.PRNGKey(0)
    k1, k2, k3, k4, k5, k6 = jax.random.split(key, 6)

    # Primary case (module-spec shape): NCHW batch=2, channels=4, spatial=16x16.
    pred = jax.nn.sigmoid(jax.random.normal(k1, (2, 4, 16, 16), dtype=jnp.float32))
    targ = (jax.random.uniform(k2, (2, 4, 16, 16)) > 0.5).astype(jnp.float32)
    ref = jax.block_until_ready(ds_loss_ref(pred, targ))
    loss = jax.block_until_ready(ds_loss(pred, targ))            # short-circuit path
    loss_pl = jax.block_until_ready(_ds_loss_pallas(pred, targ))  # force Pallas path
    assert jnp.allclose(loss, ref, rtol=1e-4, atol=1e-6), (loss, ref)
    assert jnp.allclose(loss_pl, ref, rtol=1e-4, atol=1e-6), (loss_pl, ref)

    # Larger case: multiple grid steps + partial (in-kernel masked) last block,
    # no host-side padding at all.
    pred2 = jax.nn.sigmoid(jax.random.normal(k3, (3, 4, 256, 256), dtype=jnp.float32))
    targ2 = (jax.random.uniform(k4, (3, 4, 256, 256)) > 0.5).astype(jnp.float32)
    loss2 = jax.block_until_ready(ds_loss(pred2, targ2))
    ref2 = jax.block_until_ready(ds_loss_ref(pred2, targ2))
    assert jnp.allclose(loss2, ref2, rtol=1e-4, atol=1e-6), (loss2, ref2)

    # Ragged case (element count not a multiple of the 512-lane width):
    # exercises the tail-only zero-pad path.
    pred3 = jax.nn.sigmoid(jax.random.normal(k5, (2, 3, 181, 211), dtype=jnp.float32))
    targ3 = (jax.random.uniform(k6, (2, 3, 181, 211)) > 0.5).astype(jnp.float32)
    loss3 = jax.block_until_ready(ds_loss(pred3, targ3))
    ref3 = jax.block_until_ready(ds_loss_ref(pred3, targ3))
    assert jnp.allclose(loss3, ref3, rtol=1e-4, atol=1e-6), (loss3, ref3)

    print("KERNEL_OK")
</pallas_src>

<mosaic_0001>
module attributes {stable_mosaic.version = 11 : i64} {
  func.func @kernel(%arg0: i32, %arg1: memref<4x512xf32, #tpu.memory_space<vmem>>, %arg2: memref<4x512xf32, #tpu.memory_space<vmem>>, %arg3: memref<4x512xf32, #tpu.memory_space<vmem>>) attributes {dimension_semantics = [#tpu.dimension_semantics<arbitrary>], iteration_bounds = array<i64: 1>, scalar_prefetch = 0 : i64, scratch_operands = 0 : i64, tpu.core_type = #tpu.core_type<tc>, window_params = [{transform_indices = @transform_0, window_bounds = array<i64: 4, 512>}, {transform_indices = @transform_1, window_bounds = array<i64: 4, 512>}, {pipeline_mode = #tpu.pipeline_mode<synchronous>, transform_indices = @transform_2, window_bounds = array<i64: 4, 512>}]} {
    %c0_i32 = arith.constant 0 : i32
    %0 = arith.cmpi eq, %arg0, %c0_i32 : i32
    %1 = arith.extui %0 : i1 to i32
    %c0_i32_0 = arith.constant 0 : i32
    %2 = arith.cmpi ne, %1, %c0_i32_0 : i32
    scf.if %2 {
      %cst_24 = arith.constant 0.000000e+00 : f32
      %39 = vector.broadcast %cst_24 : f32 to vector<4x512xf32>
      %c0_25 = arith.constant 0 : index
      %c0_26 = arith.constant 0 : index
      %40 = vector.load %arg3[%c0_25, %c0_26] : memref<4x512xf32, #tpu.memory_space<vmem>>, vector<4x512xf32>
      tpu.vector_store %arg3[%c0_25, %c0_26], %39 {strides = array<i32>} : memref<4x512xf32, #tpu.memory_space<vmem>>, vector<4x512xf32>,
    } else {
    }
    %c0 = arith.constant 0 : index
    %c0_1 = arith.constant 0 : index
    %3 = vector.load %arg1[%c0, %c0_1] : memref<4x512xf32, #tpu.memory_space<vmem>>, vector<4x512xf32>
    %c0_2 = arith.constant 0 : index
    %c0_3 = arith.constant 0 : index
    %4 = vector.load %arg2[%c0_2, %c0_3] : memref<4x512xf32, #tpu.memory_space<vmem>>, vector<4x512xf32>
    %5 = math.log %3 : vector<4x512xf32>
    %cst = arith.constant -1.000000e+02 : f32
    %6 = vector.broadcast %cst : f32 to vector<4x512xf32>
    %7 = arith.maximumf %5, %6 : vector<4x512xf32>
    %cst_4 = arith.constant 1.000000e+00 : f32
    %8 = vector.broadcast %cst_4 : f32 to vector<4x512xf32>
    %9 = arith.subf %8, %3 : vector<4x512xf32>
    %10 = math.log %9 : vector<4x512xf32>
    %cst_5 = arith.constant -1.000000e+02 : f32
    %11 = vector.broadcast %cst_5 : f32 to vector<4x512xf32>
    %12 = arith.maximumf %10, %11 : vector<4x512xf32>
    %13 = arith.subf %7, %12 : vector<4x512xf32>
    %14 = arith.mulf %4, %13 : vector<4x512xf32>
    %15 = arith.addf %14, %12 : vector<4x512xf32>
    %cst_6 = arith.constant 0.000000e+00 : f32
    %16 = vector.broadcast %cst_6 : f32 to vector<4x512xf32>
    %17 = arith.subf %16, %15 : vector<4x512xf32>
    %c0_7 = arith.constant 0 : index
    %c0_8 = arith.constant 0 : index
    %18 = vector.load %arg3[%c0_7, %c0_8] : memref<4x512xf32, #tpu.memory_space<vmem>>, vector<1x512xf32>
    %19 = arith.mulf %3, %4 : vector<4x512xf32>
    %cst_9 = arith.constant dense<0.000000e+00> : vector<512xf32>
    %20 = vector.multi_reduction <add>, %19, %cst_9 [0] : vector<4x512xf32> to vector<512xf32>
    %21 = vector.shape_cast %20 : vector<512xf32> to vector<1x512xf32>
    %22 = arith.addf %18, %21 : vector<1x512xf32>
    %c0_10 = arith.constant 0 : index
    %c0_11 = arith.constant 0 : index
    %23 = vector.load %arg3[%c0_10, %c0_11] : memref<4x512xf32, #tpu.memory_space<vmem>>, vector<1x512xf32>
    tpu.vector_store %arg3[%c0_10, %c0_11], %22 {strides = array<i32>} : memref<4x512xf32, #tpu.memory_space<vmem>>, vector<1x512xf32>,
    %c1 = arith.constant 1 : index
    %c0_12 = arith.constant 0 : index
    %24 = vector.load %arg3[%c1, %c0_12] : memref<4x512xf32, #tpu.memory_space<vmem>>, vector<1x512xf32>
    %cst_13 = arith.constant dense<0.000000e+00> : vector<512xf32>
    %25 = vector.multi_reduction <add>, %3, %cst_13 [0] : vector<4x512xf32> to vector<512xf32>
    %26 = vector.shape_cast %25 : vector<512xf32> to vector<1x512xf32>
    %27 = arith.addf %24, %26 : vector<1x512xf32>
    %c1_14 = arith.constant 1 : index
    %c0_15 = arith.constant 0 : index
    %28 = vector.load %arg3[%c1_14, %c0_15] : memref<4x512xf32, #tpu.memory_space<vmem>>, vector<1x512xf32>
    tpu.vector_store %arg3[%c1_14, %c0_15], %27 {strides = array<i32>} : memref<4x512xf32, #tpu.memory_space<vmem>>, vector<1x512xf32>,
    %c2 = arith.constant 2 : index
    %c0_16 = arith.constant 0 : index
    %29 = vector.load %arg3[%c2, %c0_16] : memref<4x512xf32, #tpu.memory_space<vmem>>, vector<1x512xf32>
    %cst_17 = arith.constant dense<0.000000e+00> : vector<512xf32>
    %30 = vector.multi_reduction <add>, %4, %cst_17 [0] : vector<4x512xf32> to vector<512xf32>
    %31 = vector.shape_cast %30 : vector<512xf32> to vector<1x512xf32>
    %32 = arith.addf %29, %31 : vector<1x512xf32>
    %c2_18 = arith.constant 2 : index
    %c0_19 = arith.constant 0 : index
    %33 = vector.load %arg3[%c2_18, %c0_19] : memref<4x512xf32, #tpu.memory_space<vmem>>, vector<1x512xf32>
    tpu.vector_store %arg3[%c2_18, %c0_19], %32 {strides = array<i32>} : memref<4x512xf32, #tpu.memory_space<vmem>>, vector<1x512xf32>,
    %c3 = arith.constant 3 : index
    %c0_20 = arith.constant 0 : index
    %34 = vector.load %arg3[%c3, %c0_20] : memref<4x512xf32, #tpu.memory_space<vmem>>, vector<1x512xf32>
    %cst_21 = arith.constant dense<0.000000e+00> : vector<512xf32>
    %35 = vector.multi_reduction <add>, %17, %cst_21 [0] : vector<4x512xf32> to vector<512xf32>
    %36 = vector.shape_cast %35 : vector<512xf32> to vector<1x512xf32>
    %37 = arith.addf %34, %36 : vector<1x512xf32>
    %c3_22 = arith.constant 3 : index
    %c0_23 = arith.constant 0 : index
    %38 = vector.load %arg3[%c3_22, %c0_23] : memref<4x512xf32, #tpu.memory_space<vmem>>, vector<1x512xf32>
    tpu.vector_store %arg3[%c3_22, %c0_23], %37 {strides = array<i32>} : memref<4x512xf32, #tpu.memory_space<vmem>>, vector<1x512xf32>,
    return
  }
  func.func @transform_0(%arg0: i32) -> (i32, i32) {
    %c0_i32 = arith.constant 0 : i32
    %c0_i32_0 = arith.constant 0 : i32
    return %arg0, %c0_i32 : i32, i32
  }
  func.func @transform_1(%arg0: i32) -> (i32, i32) {
    %c0_i32 = arith.constant 0 : i32
    %c0_i32_0 = arith.constant 0 : i32
    return %arg0, %c0_i32 : i32, i32
  }
  func.func @transform_2(%arg0: i32) -> (i32, i32) {
    %c0_i32 = arith.constant 0 : i32
    %c0_i32_0 = arith.constant 0 : i32
    %c0_i32_1 = arith.constant 0 : i32
    return %c0_i32, %c0_i32_0 : i32, i32
  }
}

</mosaic_0001>

<bundles_post_ra>
// kernel: tpu_custom_call.1
= control target key start
LH: loop header
LB: loop body
LE: loop exit
PB: predicated region body
PF: predicated region fallthrough
CT: control target
= control target key end

     0   :  { %7 = vsyncpa [#allocation3], 0  ;;  %s486_s0 = inlined_call_operand.hbm [shape: f32[4,512], index: 0, kind: input, shape index: {}]   ;;  %s487_s1 = inlined_call_operand.hbm [shape: f32[4,512], index: 1, kind: input, shape index: {}]   ;;  %s488_s2 = inlined_call_operand.hbm [shape: f32[4,512], index: 2, kind: output, shape index: {}]  }
   0x1   :  { %8 = vsyncpa [#allocation6], 0 }
   0x2   :  { %9 = vsyncpa [#allocation4], 0  ;;  %s15_s11 = sshll.u32 %s486_s0, 4  ;;  %s413_s12 = smov [#allocation2]   ;;  %s16_s11 = int_to_ptr.hbm [resolvable:$true] %s15_s11 }
   0x3   :  { %s17_s13 = sshll.u32 %s413_s12, 4  ;;  %s26_s16 = sshll.u32 %s487_s1, 4  ;;  %s18_s13 = int_to_ptr.vmem [resolvable:$true] %s17_s13  ;;  %s27_s16 = int_to_ptr.hbm [resolvable:$true] %s26_s16 }
   0x4   :  { %20 = dma.hbm_to_vmem [thread:$0]  %s16_s11, 256, %s18_s13, [#allocation3]  }
   0x5   :  { %s414_s17 = smov [#allocation5]  }
   0x6   :  { %s28_s18 = sshll.u32 %s414_s17, 4  ;;  %s29_s18 = int_to_ptr.vmem [resolvable:$true] %s28_s18 }
   0x7   :  { %31 = dma.hbm_to_vmem [thread:$0]  %s27_s16, 256, %s29_s18, [#allocation6]  }
   0x8   :  { %407 = dma.done.wait [#allocation3], 256  }
   0x9   :  { %408 = vsyncadd [#allocation3], 4294967040 }
   0xa   :  { %409 = dma.done.wait [#allocation6], 256  }
   0xb   :  { %410 = vsyncadd [#allocation6], 4294967040  ;;  %v415_v0 = vmov 0.0   ;;  %v46_v1 = vld [vmem:[#allocation2] sm:$0xff]  ;;  %v48_v2 = vld [vmem:[#allocation5] sm:$0xff]  ;;  %vm88_vm0 = vcmask 1043456   ;;  %v132_v52 = vlaneseq }
   0xc   :  { %44 = vst [vmem:[#allocation7] sm:$0xff] %v415_v0  ;;  %v47_v3 = vld [vmem:[#allocation2 + $0x8] sm:$0xff]  ;;  %327 = vlog2.f32 %v46_v1  ;;  %v56_v4 = vsub.f32 1.0, %v46_v1  ;;  %v73_v5 = vmul.f32 %v48_v2, %v46_v1  ;;  %v438_v6 = vld [vmem:[#allocation5 + $0x8] sm:$0xff]  ;;  %vm124_vm1 = vcmask 1040384   ;;  %s416_s0 = smov [#allocation7]  }
   0xd   :  { %45 = vst [vmem:[#allocation7 + $0x8] sm:$0xff] %v415_v0  ;;  %v57_v7 = vsub.f32 1.0, %v47_v3  ;;  %329 = vlog2.f32 %v47_v3  ;;  %v74_v8 = vmul.f32 %v438_v6, %v47_v3  ;;  %vm126_vm2 = vcmask 1042434   ;;  %s310_s1 = sshll.u32 %s416_s0, 4  ;;  %s312_s21 = sshll.u32 %s488_s2, 4  ;;  %s311_s1 = int_to_ptr.vmem [resolvable:$true] %s310_s1  ;;  %s313_s21 = int_to_ptr.hbm [resolvable:$true] %s312_s21 }
   0xe   :  { %331 = vlog2.f32 %v56_v4  ;;  %77 = vst [vmem:[#allocation1] ss:$2 sm:$0xff] %v73_v5  ;;  %vm128_vm3 = vcmask 1041408   ;;  %vm454_vm4 = vcmp.lt.s32.totalorder %v132_v52, 512 }
   0xf   :  { %333 = vlog2.f32 %v57_v7  ;;  %79 = vst [vmem:[#allocation1 + $0x10] ss:$2 sm:$0xff] %v74_v8 }
  0x12   :  { %v328_v9 = vpop.eup %327 }
  0x13   :  { %v330_v10 = vpop.eup %329  ;;  %v51_v11 = vmul.f32 0.6931472, %v328_v9 }
  0x14   :  { %v332_v12 = vpop.eup %331  ;;  %v53_v13 = vmul.f32 0.6931472, %v330_v10 }
  0x15   :  { %v334_v14 = vpop.eup %333  ;;  %v54_v15 = vmax.f32 %v51_v11, -100.0  ;;  %v59_v16 = vmul.f32 0.6931472, %v332_v12  ;;  %v80_v17 = vld.sshfl [vmem:[#allocation1] sm:$0xff pattern:$0x75316420] }
  0x16   :  { %v55_v18 = vmax.f32 %v53_v13, -100.0  ;;  %v61_v19 = vmul.f32 0.6931472, %v334_v14  ;;  %v81_v20 = vld.sshfl [vmem:[#allocation1 + $0x8] sm:$0xff pattern:$0x75316420] }
  0x17   :  { %v62_v21 = vmax.f32 %v59_v16, -100.0  ;;  %v89_v22 = vsel %vm88_vm0, %v80_v17, 0.0  ;;  %v96_v23 = vsel %vm88_vm0, %v81_v20, 0.0  ;;  %141 = vst [vmem:[#allocation1] ss:$2 sm:$0xff] %v46_v1 }
  0x18   :  { %v63_v24 = vmax.f32 %v61_v19, -100.0  ;;  %v90_v25 = vrot.slane %v89_v22, 4  ;;  %v97_v26 = vrot.slane %v96_v23, 4  ;;  %v82_v27 = vld.sshfl [vmem:[#allocation1 + $0x10] sm:$0xff pattern:$0x75316420] }
  0x19   :  { %v64_v28 = vsub.f32 %v54_v15, %v62_v21  ;;  %v83_v29 = vld.sshfl [vmem:[#allocation1 + $0x18] sm:$0xff pattern:$0x75316420]  ;;  %v103_v30 = vsel %vm88_vm0, %v82_v27, 0.0 }
  0x1a   :  { %v65_v31 = vsub.f32 %v55_v18, %v63_v24  ;;  %v91_v32 = vadd.f32 %v90_v25, %v89_v22  ;;  %v98_v33 = vadd.f32 %v97_v26, %v96_v23  ;;  %v104_v34 = vrot.slane %v103_v30, 4  ;;  %143 = vst [vmem:[#allocation1 + $0x10] ss:$2 sm:$0xff] %v47_v3  ;;  %v72_v27 = vld [vmem:[#allocation7] ss:$4 sm:$0xf] }
  0x1b   :  { %v110_v35 = vsel %vm88_vm0, %v83_v29, 0.0  ;;  %v66_v36 = vmul.f32 %v64_v28, %v48_v2 }
  0x1c   :  { %v92_v37 = vrot.slane %v91_v32, 2  ;;  %v99_v38 = vrot.slane %v98_v33, 2  ;;  %v105_v39 = vadd.f32 %v104_v34, %v103_v30  ;;  %v67_v40 = vmul.f32 %v65_v31, %v438_v6 }
  0x1d   :  { %v111_v41 = vrot.slane %v110_v35, 4  ;;  %v68_v49 = vadd.f32 %v66_v36, %v62_v21 }
  0x1e   :  { %v93_v42 = vadd.f32 %v92_v37, %v91_v32  ;;  %v100_v43 = vadd.f32 %v99_v38, %v98_v33  ;;  %v106_v44 = vrot.slane %v105_v39, 2  ;;  %v144_v45 = vld.sshfl [vmem:[#allocation1] sm:$0xff pattern:$0x75316420]  ;;  %v69_v53 = vadd.f32 %v67_v40, %v63_v24 }
  0x1f   :  { %v112_v46 = vadd.f32 %v111_v41, %v110_v35  ;;  %v145_v47 = vld.sshfl [vmem:[#allocation1 + $0x8] sm:$0xff pattern:$0x75316420]  ;;  %v152_v48 = vsel %vm88_vm0, %v144_v45, 0.0  ;;  %v70_v3 = vsub.f32 0.0, %v68_v49 }
  0x20   :  { %v101_v50 = vrot.slane %v100_v43, 1  ;;  %v107_v51 = vadd.f32 %v106_v44, %v105_v39  ;;  %197 = vst [vmem:[#allocation1] ss:$2 sm:$0xff] %v48_v2  ;;  %v153_v55 = vrot.slane %v152_v48, 4  ;;  %v159_v56 = vsel %vm88_vm0, %v145_v47, 0.0 }
  0x21   :  { %v113_v54 = vrot.slane %v112_v46, 2  ;;  %v146_v57 = vld.sshfl [vmem:[#allocation1 + $0x10] sm:$0xff pattern:$0x75316420]  ;;  %v94_v58 = vrot.slane %v93_v42, 1  ;;  %v160_v61 = vrot.slane %v159_v56, 4 }
  0x22   :  { %v102_v59 = vadd.f32 %v101_v50, %v100_v43  ;;  %v108_v60 = vrot.slane %v107_v51, 1  ;;  %v147_v62 = vld.sshfl [vmem:[#allocation1 + $0x18] sm:$0xff pattern:$0x75316420]  ;;  %v154_v0 = vadd.f32 %v153_v55, %v152_v48  ;;  %v166_v1 = vsel %vm88_vm0, %v146_v57, 0.0 }
  0x23   :  { %v114_v63 = vadd.f32 %v113_v54, %v112_v46  ;;  %v173_v2 = vsel %vm88_vm0, %v147_v62, 0.0  ;;  %199 = vst [vmem:[#allocation1 + $0x10] ss:$2 sm:$0xff] %v438_v6  ;;  %v161_v5 = vadd.f32 %v160_v61, %v159_v56  ;;  %v167_v7 = vrot.slane %v166_v1, 4 }
  0x24   :  { %v109_v4 = vadd.f32 %v108_v60, %v107_v51  ;;  %v121_v8 = vrot.slane %v102_v59, 7  ;;  %v155_v10 = vrot.slane %v154_v0, 2  ;;  %v174_v11 = vrot.slane %v173_v2, 4  ;;  %v138_v56 = vld [vmem:[#allocation7 + $0x1] ss:$4 sm:$0xf] }
  0x25   :  { %v115_v9 = vrot.slane %v114_v63, 1  ;;  %v71_v12 = vsub.f32 0.0, %v69_v53  ;;  %v162_v14 = vrot.slane %v161_v5, 2  ;;  %v168_v15 = vadd.f32 %v167_v7, %v166_v1 }
  0x26   :  { %v122_v13 = vrot.slane %v109_v4, 6  ;;  %v95_v16 = vadd.f32 %v94_v58, %v93_v42  ;;  %v156_v18 = vadd.f32 %v155_v10, %v154_v0  ;;  %v175_v19 = vadd.f32 %v174_v11, %v173_v2 }
  0x27   :  { %v116_v17 = vadd.f32 %v115_v9, %v114_v63  ;;  %v200_v20 = vld.sshfl [vmem:[#allocation1] sm:$0xff pattern:$0x75316420]  ;;  %v201_v21 = vld.sshfl [vmem:[#allocation1 + $0x8] sm:$0xff pattern:$0x75316420]  ;;  %v163_v22 = vadd.f32 %v162_v14, %v161_v5 }
  0x28   :  { %v169_v6 = vrot.slane %v168_v15, 2  ;;  %v208_v23 = vsel %vm88_vm0, %v200_v20, 0.0  ;;  %v215_v24 = vsel %vm88_vm0, %v201_v21, 0.0  ;;  %253 = vst [vmem:[#allocation1] ss:$2 sm:$0xff] %v70_v3  ;;  %v176_v26 = vrot.slane %v175_v19, 2 }
  0x29   :  { %v123_v25 = vrot.slane %v116_v17, 5  ;;  %v125_v28 = vsel %vm124_vm1, %v95_v16, %v121_v8  ;;  %v164_v30 = vrot.slane %v163_v22, 1  ;;  %v209_v32 = vrot.slane %v208_v23, 4 }
  0x2a   :  { %v170_v31 = vadd.f32 %v169_v6, %v168_v15  ;;  %v216_v33 = vrot.slane %v215_v24, 4  ;;  %v202_v34 = vld.sshfl [vmem:[#allocation1 + $0x10] sm:$0xff pattern:$0x75316420]  ;;  %v157_v35 = vrot.slane %v156_v18, 1  ;;  %v177_v36 = vadd.f32 %v176_v26, %v175_v19 }
  0x2b   :  { %v203_v37 = vld.sshfl [vmem:[#allocation1 + $0x18] sm:$0xff pattern:$0x75316420]  ;;  %v222_v38 = vsel %vm88_vm0, %v202_v34, 0.0  ;;  %v127_v39 = vsel %vm126_vm2, %v122_v13, %v123_v25  ;;  %v165_v47 = vadd.f32 %v164_v30, %v163_v22  ;;  %v210_v49 = vadd.f32 %v209_v32, %v208_v23 }
  0x2c   :  { %v171_v40 = vrot.slane %v170_v31, 1  ;;  %v223_v41 = vrot.slane %v222_v38, 4  ;;  %v229_v42 = vsel %vm88_vm0, %v203_v37, 0.0  ;;  %255 = vst [vmem:[#allocation1 + $0x10] ss:$2 sm:$0xff] %v71_v12  ;;  %v129_v43 = vsel %vm128_vm3, %v125_v28, %v127_v39 }
  0x2d   :  { %v178_v44 = vrot.slane %v177_v36, 1  ;;  %v230_v45 = vrot.slane %v229_v42, 4  ;;  %v131_v46 = vadd.f32 %v129_v43, %v72_v27  ;;  %v217_v50 = vadd.f32 %v216_v33, %v215_v24  ;;  %v194_v34 = vld [vmem:[#allocation7 + $0x2] ss:$4 sm:$0xf] }
  0x2e   :  { %v172_v48 = vadd.f32 %v171_v40, %v170_v31  ;;  %v224_v51 = vadd.f32 %v223_v41, %v222_v38  ;;  %v158_v52 = vadd.f32 %v157_v35, %v156_v18  ;;  %v184_v54 = vrot.slane %v165_v47, 7 }
  0x2f   :  { %136 = vst.msk [vmem:[#allocation7] ss:$4 sm:$0xf] %vm454_vm4, %v131_v46  ;;  %v179_v53 = vadd.f32 %v178_v44, %v177_v36  ;;  %v231_v55 = vadd.f32 %v230_v45, %v229_v42  ;;  %v211_v58 = vrot.slane %v210_v49, 2  ;;  %v218_v59 = vrot.slane %v217_v50, 2 }
  0x30   :  { %v185_v57 = vrot.slane %v172_v48, 6  ;;  %v225_v60 = vrot.slane %v224_v51, 2  ;;  %v187_v62 = vsel %vm124_vm1, %v158_v52, %v184_v54  ;;  %v256_v0 = vld.sshfl [vmem:[#allocation1] sm:$0xff pattern:$0x75316420] }
  0x31   :  { %v186_v61 = vrot.slane %v179_v53, 5  ;;  %v232_v63 = vrot.slane %v231_v55, 2  ;;  %v212_v1 = vadd.f32 %v211_v58, %v210_v49  ;;  %v219_v2 = vadd.f32 %v218_v59, %v217_v50  ;;  %v257_v4 = vld.sshfl [vmem:[#allocation1 + $0x8] sm:$0xff pattern:$0x75316420] }
  0x32   :  { %v226_v3 = vadd.f32 %v225_v60, %v224_v51  ;;  %v264_v5 = vsel %vm88_vm0, %v256_v0, 0.0  ;;  %v271_v18 = vsel %vm88_vm0, %v257_v4, 0.0  ;;  %v250_v60 = vld [vmem:[#allocation7 + $0x3] ss:$4 sm:$0xf] }
  0x33   :  { %v188_v7 = vsel %vm126_vm2, %v185_v57, %v186_v61  ;;  %v233_v8 = vadd.f32 %v232_v63, %v231_v55  ;;  %v258_v9 = vld.sshfl [vmem:[#allocation1 + $0x10] sm:$0xff pattern:$0x75316420]  ;;  %v213_v11 = vrot.slane %v212_v1, 1  ;;  %v220_v12 = vrot.slane %v219_v2, 1 }
  0x34   :  { %v189_v10 = vsel %vm128_vm3, %v187_v62, %v188_v7  ;;  %v227_v13 = vrot.slane %v226_v3, 1  ;;  %v259_v14 = vld.sshfl [vmem:[#allocation1 + $0x18] sm:$0xff pattern:$0x75316420]  ;;  %v265_v17 = vrot.slane %v264_v5, 4  ;;  %v272_v22 = vrot.slane %v271_v18, 4 }
  0x35   :  { %v191_v15 = vadd.f32 %v189_v10, %v138_v56  ;;  %v234_v16 = vrot.slane %v233_v8, 1  ;;  %v214_v19 = vadd.f32 %v213_v11, %v212_v1  ;;  %v221_v20 = vadd.f32 %v220_v12, %v219_v2 }
  0x36   :  { %v228_v21 = vadd.f32 %v227_v13, %v226_v3  ;;  %v266_v23 = vadd.f32 %v265_v17, %v264_v5  ;;  %v278_v24 = vsel %vm88_vm0, %v258_v9, 0.0  ;;  %v285_v25 = vsel %vm88_vm0, %v259_v14, 0.0 }
  0x37   :  { %192 = vst.msk [vmem:[#allocation7 + $0x1] ss:$4 sm:$0xf] %vm454_vm4, %v191_v15  ;;  %v235_v6 = vadd.f32 %v234_v16, %v233_v8  ;;  %v240_v26 = vrot.slane %v221_v20, 7  ;;  %v273_v28 = vadd.f32 %v272_v22, %v271_v18  ;;  %v279_v30 = vrot.slane %v278_v24, 4 }
  0x38   :  { %v241_v27 = vrot.slane %v228_v21, 6  ;;  %v267_v32 = vrot.slane %v266_v23, 2  ;;  %v286_v33 = vrot.slane %v285_v25, 4 }
  0x39   :  { %v242_v31 = vrot.slane %v235_v6, 5  ;;  %v243_v35 = vsel %vm124_vm1, %v214_v19, %v240_v26  ;;  %v274_v36 = vrot.slane %v273_v28, 2  ;;  %v280_v37 = vadd.f32 %v279_v30, %v278_v24 }
  0x3a   :  { %v268_v39 = vadd.f32 %v267_v32, %v266_v23  ;;  %v287_v40 = vadd.f32 %v286_v33, %v285_v25 }
  0x3b   :  { %v244_v38 = vsel %vm126_vm2, %v241_v27, %v242_v31  ;;  %v275_v42 = vadd.f32 %v274_v36, %v273_v28  ;;  %v281_v43 = vrot.slane %v280_v37, 2 }
  0x3c   :  { %v245_v41 = vsel %vm128_vm3, %v243_v35, %v244_v38  ;;  %v288_v45 = vrot.slane %v287_v40, 2  ;;  %v269_v48 = vrot.slane %v268_v39, 1 }
  0x3d   :  { %v247_v44 = vadd.f32 %v245_v41, %v194_v34  ;;  %v276_v46 = vrot.slane %v275_v42, 1  ;;  %v282_v47 = vadd.f32 %v281_v43, %v280_v37 }
  0x3e   :  { %v289_v49 = vadd.f32 %v288_v45, %v287_v40  ;;  %v270_v55 = vadd.f32 %v269_v48, %v268_v39 }
  0x3f   :  { %248 = vst.msk [vmem:[#allocation7 + $0x2] ss:$4 sm:$0xf] %vm454_vm4, %v247_v44  ;;  %v277_v50 = vadd.f32 %v276_v46, %v275_v42  ;;  %v283_v51 = vrot.slane %v282_v47, 1 }
  0x40   :  { %v290_v52 = vrot.slane %v289_v49, 1 }
  0x41   :  { %v284_v53 = vadd.f32 %v283_v51, %v282_v47  ;;  %v296_v54 = vrot.slane %v277_v50, 7 }
  0x42   :  { %v291_v56 = vadd.f32 %v290_v52, %v289_v49 }
  0x43   :  { %v297_v57 = vrot.slane %v284_v53, 6  ;;  %v299_v59 = vsel %vm124_vm1, %v270_v55, %v296_v54 }
  0x44   :  { %v298_v58 = vrot.slane %v291_v56, 5 }
  0x46   :  { %v300_v61 = vsel %vm126_vm2, %v297_v57, %v298_v58 }
  0x47   :  { %v301_v62 = vsel %vm128_vm3, %v299_v59, %v300_v61 }
  0x48   :  { %v303_v63 = vadd.f32 %v301_v62, %v250_v60 }
  0x4a   :  { %304 = vst.msk [vmem:[#allocation7 + $0x3] ss:$4 sm:$0xf] %vm454_vm4, %v303_v63 }
  0x4b   :  { %315 = dma.vmem_to_hbm [thread:$0]  %s311_s1, 256, %s313_s21, [#allocation4]  }
  0x4c   :  { %411 = dma.done.wait [#allocation4], 256  }
  0x4d   :  { %412 = vsyncadd [#allocation4], 4294967040 }
  0x4e   :  { %320 = vsyncpa [#allocation3], 1 }
  0x4f   :  { %321 = vsyncpa [#allocation6], 1 }
  0x50   :  { %322 = vsyncpa [#allocation4], 1 }

</bundles_post_ra>
